<compile_context>
chip_gen: v5e
topology: v5e:2x2
jax: 0.10.0
libtpu: 0.0.40
codegen_flags: <defaults>
</compile_context>

<pallas_src>
import jax
import jax.numpy as jnp
import numpy as np
from jax.experimental import pallas as pl
from jax.experimental.pallas import tpu as pltpu


# ------------------------------- helpers -----------------------------------


def _pick_tile(n: int, cap: int, unit: int) -> int:
    """Tile for an axis of extent n: prefer a multiple of `unit` <= cap that
    divides n; n itself if it already fits; otherwise `cap` (the ragged last
    block is then handled by a cdiv grid + Pallas boundary masking)."""
    cap = max(unit, (cap // unit) * unit)
    if n <= cap:
        return n
    t = cap
    while t >= unit:
        if n % t == 0:
            return t
        t -= unit
    return cap


def _padded_lane_bytes(channels: int, dtype) -> int:
    """Bytes per lane of a (C, lanes) VMEM tile after sublane padding
    ((8,128) for f32, (16,128) for bf16, (32,128) for int8)."""
    item = np.dtype(dtype).itemsize
    sub = 8 * max(1, 4 // item)
    return ((channels + sub - 1) // sub) * sub * item


def _physical_vmem_bytes() -> int:
    try:
        return int(pltpu.get_tpu_info().vmem_capacity_bytes)
    except Exception:
        return 64 << 20          # assume the smallest part (v7x per-TC) if unknown


def _vmem_budget_bytes() -> int:
    """Conservative double-buffered working-set budget: ~1/3 of physical VMEM
    (~21 MiB on v7x, ~42 MiB on v5e/v6e)."""
    return _physical_vmem_bytes() // 3


def _vmem_limit_for(footprint_bytes: int) -> int:
    """Scoped-VMEM request: block footprint + 25% headroom + a few MiB for
    compiler-internal scratch; never below the 32 MiB default, never above
    ~90% of physical."""
    want = int(footprint_bytes) + int(footprint_bytes) // 4 + (4 << 20)
    want = max(want, 32 << 20)
    return min(want, _physical_vmem_bytes() * 9 // 10)


# ----------------------------- Pallas kernels ------------------------------


def _upscaler_kernel(s1_ref, bias_ref, wxt_ref, wlrt_ref, x_ref, lr_ref, o_ref):
    """One (batch, spatial-tile) block of the synthetic inner model, channels-first.

    s1_ref:   (B,)          SMEM f32            1/sqrt(sigma^2 + 1)
    bias_ref: (1, Cout, 1)  VMEM f32            per-batch additive bias (pre-scaled by s2)
    wxt_ref:  (Cout, Cx)    VMEM compute dtype  W[:Cx].T
    wlrt_ref: (Cout, Clr)   VMEM compute dtype  W[Cx:].T
    x_ref:    (1, Cx,  HWT) VMEM input dtype    x flattened to [B, C, H*W]
    lr_ref:   (1, Clr, HWT) VMEM input dtype    low_res, same layout
    o_ref:    (1, Cout, HWT) VMEM out dtype

    Output stays lane-dense: Cout on sublanes, H*W on lanes -> unmasked stores.
    """
    b = pl.program_id(0)
    mm_dtype = wxt_ref.dtype
    # Cast to the matmul dtype on the VMEM tile (free; VPU slot has slack) —
    # avoids a wrapper-side f32->bf16 HBM pass over x / low_res.
    y = jnp.dot(wxt_ref[...], x_ref[0].astype(mm_dtype),
                preferred_element_type=jnp.float32)
    y = y + jnp.dot(wlrt_ref[...], lr_ref[0].astype(mm_dtype),
                    preferred_element_type=jnp.float32)
    # f32 epilogue (v5e VPU has no bf16 path); cast only at the final store.
    o_ref[0] = (y * s1_ref[b] + bias_ref[0]).astype(o_ref.dtype)


def _cfg_combine_kernel(scale_ref, y2_ref, o_ref):
    """uncond + (cond - uncond) * cond_scale on a dense [2, rows, lanes] block.

    scale_ref: (1,) SMEM f32 — passed as data so changing the guidance scale
    does not force a recompile.  Arithmetic in f32, cast only at the store."""
    s = scale_ref[0]
    u = y2_ref[0].astype(jnp.float32)
    c = y2_ref[1].astype(jnp.float32)
    o_ref[...] = (u + (c - u) * s).astype(o_ref.dtype)


# ------------------------------ JAX wrappers -------------------------------


class PallasInnerModel:
    """Deterministic synthetic stand-in for the wrapped diffusion upscaler:

        out[b] = (concat([x, low_res], channel) @ W) / sqrt(sigma[b]^2 + 1)
               + (mean_seq(c[b]) @ Wc)              / sqrt(low_res_sigma[b]^2 + 1)

    The hot path (channel matmul + scale/bias epilogue) runs in one Pallas
    kernel over [B, C, H*W] blocks (H*W on the 128-lane axis, no NCHW<->NHWC
    transposes).  The tiny conditioning projection is hoisted to XLA f32.
    """

    def __init__(self, params, compute_dtype=jnp.bfloat16, out_dtype=None,
                 hw_tile_cap=65536):
        w, wc = params
        self.compute_dtype = compute_dtype
        self.out_dtype = out_dtype            # None -> inherit x.dtype
        self.hw_tile_cap = int(hw_tile_cap)
        self.cx = int(w.shape[1])                         # output channels == Cx
        self.wc = wc.astype(jnp.float32)                  # [D, Cout], bias path (f32, XLA)
        # Tiny (Cout, Cin) weights, pre-split/transposed for the channels-first matmul.
        self.wxt = w[: self.cx].T.astype(compute_dtype)   # [Cout, Cx]
        self.wlrt = w[self.cx:].T.astype(compute_dtype)   # [Cout, Clr]

    # ---- small XLA-side pieces (negligible work; keeps the kernel one clean matmul)

    def _scales(self, sigma, low_res_sigma):
        s1 = jax.lax.rsqrt(sigma.astype(jnp.float32) ** 2 + 1.0)
        s2 = jax.lax.rsqrt(low_res_sigma.astype(jnp.float32) ** 2 + 1.0)
        return s1, s2

    def _cond_bias(self, c_list):
        # [B, S, D] -> mean over S -> [B, D] @ [D, Cout] -> [B, Cout]   (f32)
        return jnp.mean(c_list[0].astype(jnp.float32), axis=1) @ self.wc

    # ---- Pallas hot path

    def _forward_core(self, x, low_res, s1, bias):
        B, Cx, H, W = x.shape
        Clr = low_res.shape[1]
        cout = self.wxt.shape[0]
        HW = H * W
        out_dtype = self.out_dtype if self.out_dtype is not None else x.dtype

        # Generation-aware lane-tile cap: double-buffered per-lane footprint of
        # the (sublane-padded) input/output channel blocks vs ~1/3 of physical
        # VMEM (64 MiB on v7x, 128 MiB on v5e/v6e).
        per_lane = 2 * (_padded_lane_bytes(Cx, x.dtype)
                        + _padded_lane_bytes(Clr, low_res.dtype)
                        + _padded_lane_bytes(cout, out_dtype))
        cap = min(self.hw_tile_cap, max(128, _vmem_budget_bytes() // per_lane))
        hw_tile = _pick_tile(HW, cap, 128)
        n_tiles = pl.cdiv(HW, hw_tile)
        # Keep the total grid even so both v7x TensorCores stay busy.
        if (B % 2) and (n_tiles % 2) and hw_tile % 256 == 0 and HW % hw_tile == 0:
            hw_tile //= 2
            n_tiles *= 2

        # Free reshapes only — no wrapper-side dtype cast (that would cost a
        # full extra HBM read+write of both inputs before the kernel runs).
        x3 = x.reshape(B, Cx, HW)
        lr3 = low_res.reshape(B, Clr, HW)
        bias3 = bias.astype(jnp.float32).reshape(B, cout, 1)
        s1 = s1.astype(jnp.float32)

        out = pl.pallas_call(
            _upscaler_kernel,
            out_shape=jax.ShapeDtypeStruct((B, cout, HW), out_dtype),
            grid_spec=pltpu.PrefetchScalarGridSpec(
                num_scalar_prefetch=0,
                grid=(B, n_tiles),
                in_specs=[
                    pl.BlockSpec(memory_space=pltpu.SMEM),                    # s1  (B,)
                    pl.BlockSpec((1, cout, 1), lambda b, t: (b, 0, 0)),       # bias
                    pl.BlockSpec((cout, Cx), lambda b, t: (0, 0)),            # Wx^T
                    pl.BlockSpec((cout, Clr), lambda b, t: (0, 0)),           # Wlr^T
                    pl.BlockSpec((1, Cx, hw_tile), lambda b, t: (b, 0, t)),   # x
                    pl.BlockSpec((1, Clr, hw_tile), lambda b, t: (b, 0, t)),  # low_res
                ],
                out_specs=pl.BlockSpec((1, cout, hw_tile), lambda b, t: (b, 0, t)),
            ),
            compiler_params=pltpu.CompilerParams(
                dimension_semantics=("parallel", "parallel"),
                vmem_limit_bytes=_vmem_limit_for(per_lane * hw_tile),
            ),
        )(s1, bias3, self.wxt, self.wlrt, x3, lr3)

        return out.reshape(B, cout, H, W)

    def __call__(self, x, sigma, low_res, low_res_sigma, c):
        s1, s2 = self._scales(sigma, low_res_sigma)
        bias = self._cond_bias(c) * s2[:, None]
        return self._forward_core(x, low_res, s1, bias)

    def cfg_forward(self, x, sigma, low_res, low_res_sigma, uc, c, cond_scale):
        """Fused CFG forward: no batch doubling, no second kernel.

        For this inner model the x-path matmul and the sigma scales are
        identical for the uncond/cond halves, so the CFG combine folds into a
        pre-combined per-batch bias applied in the kernel epilogue."""
        s1, s2 = self._scales(sigma, low_res_sigma)
        bias_u = self._cond_bias(uc)
        bias_c = self._cond_bias(c)
        bias = (bias_u + (bias_c - bias_u) * cond_scale) * s2[:, None]
        return self._forward_core(x, low_res, s1, bias)


def cfg_combine_pallas(y_doubled, cond_scale, *, out_dtype=None, row_tile_cap=4096):
    """Generic CFG combine over a doubled-batch output [2B, ...] (first B = uncond)."""
    B2 = y_doubled.shape[0]
    assert B2 % 2 == 0, "doubled batch expected (first half uncond, second half cond)"
    B = B2 // 2
    rest = y_doubled.shape[1:]
    flat = int(np.prod(rest))
    total = B * flat
    out_dtype = out_dtype if out_dtype is not None else y_doubled.dtype
    in_item = np.dtype(y_doubled.dtype).itemsize
    out_item = np.dtype(out_dtype).itemsize

    if total % 128 == 0:
        # Sublane-dense view of each half: [rows, 128]; tile rows (multiples of 8).
        R, L = total // 128, 128
        r_tile = _pick_tile(R, row_tile_cap, 8)
        l_tile = L
        grid = (pl.cdiv(R, r_tile),)
        in_idx = lambda t: (0, t, 0)
        out_idx = lambda t: (t, 0)
    else:
        # Fallback [2, B, flat] view (accepts B<8 sublane padding); tile lanes.
        # TODO(synk): pad `flat` to a multiple of 128 upstream for full lane density.
        R, L = B, flat
        r_tile = R
        l_tile = _pick_tile(L, 8 * row_tile_cap, 128)
        grid = (pl.cdiv(L, l_tile),)
        in_idx = lambda t: (0, 0, t)
        out_idx = lambda t: (0, t)

    y2 = y_doubled.reshape(2, R, L)
    pad_r = -(-r_tile // 8) * 8
    pad_l = -(-l_tile // 128) * 128
    footprint = 2 * pad_r * pad_l * (2 * in_item + out_item)   # double-buffered in + out
    scale_arr = jnp.asarray([cond_scale], jnp.float32)          # SMEM: no recompile per scale

    out = pl.pallas_call(
        _cfg_combine_kernel,
        out_shape=jax.ShapeDtypeStruct((R, L), out_dtype),
        grid_spec=pltpu.PrefetchScalarGridSpec(
            num_scalar_prefetch=0,
            grid=grid,
            in_specs=[pl.BlockSpec(memory_space=pltpu.SMEM),
                      pl.BlockSpec((2, r_tile, l_tile), in_idx)],
            out_specs=pl.BlockSpec((r_tile, l_tile), out_idx),
        ),
        compiler_params=pltpu.CompilerParams(
            dimension_semantics=("parallel",),
            vmem_limit_bytes=_vmem_limit_for(footprint),
        ),
    )(scale_arr, y2)
    return out.reshape((B,) + rest)


class CFGUpscaler:
    """JAX/Pallas port of stable_diffusion_with_upscaler.custom_models.CFGUpscaler."""

    def __init__(self, model, uc, cond_scale):
        self.inner_model = model
        self.uc = uc                      # list of conditioning tensors
        self.cond_scale = float(cond_scale)

    def __call__(self, x, sigma, low_res, low_res_sigma, c):
        if self.cond_scale in (0.0, 1.0):
            c_in = self.uc if self.cond_scale == 0.0 else c
            return self.inner_model(x, sigma, low_res, low_res_sigma, c_in)

        if hasattr(self.inner_model, "cfg_forward"):
            # Fast path: CFG combine fused into the inner model's epilogue; no
            # physical batch doubling, no intermediate [2B, C, H, W] HBM round-trip.
            # Only valid for inner models linear in the conditioning (true here).
            return self.inner_model.cfg_forward(
                x, sigma, low_res, low_res_sigma, self.uc, c, self.cond_scale)

        # Generic fallback (matches the PyTorch control flow exactly).
        # TODO(synk): a real (nonlinear) U-Net inner model must take this
        # doubled-forward + combine path; fusing the combine into its final
        # kernel (or aliasing the uncond half) would save one HBM pass.
        x_in = jnp.concatenate([x] * 2, axis=0)
        sigma_in = jnp.concatenate([sigma] * 2, axis=0)
        low_res_in = jnp.concatenate([low_res] * 2, axis=0)
        low_res_sigma_in = jnp.concatenate([low_res_sigma] * 2, axis=0)
        c_in = [jnp.concatenate([uc_i, c_i], axis=0) for uc_i, c_i in zip(self.uc, c)]
        y = self.inner_model(x_in, sigma_in, low_res_in, low_res_sigma_in, c_in)
        return cfg_combine_pallas(y, self.cond_scale)


# --------------------------- reference (pure JAX) ---------------------------


def _inner_model_ref(params, x, sigma, low_res, low_res_sigma, c_list):
    w, wc = params
    xh = jnp.transpose(x, (0, 2, 3, 1))
    lh = jnp.transpose(low_res, (0, 2, 3, 1))
    h = jnp.concatenate([xh, lh], axis=-1)
    y = jnp.einsum("bhwc,cd->bhwd", h, w)
    bias = jnp.mean(c_list[0], axis=1) @ wc
    s1 = 1.0 / jnp.sqrt(sigma ** 2 + 1.0)
    s2 = 1.0 / jnp.sqrt(low_res_sigma ** 2 + 1.0)
    out = y * s1[:, None, None, None] + bias[:, None, None, :] * s2[:, None, None, None]
    return jnp.transpose(out, (0, 3, 1, 2))


# ----------------------------------- main -----------------------------------


if __name__ == "__main__":
    key = jax.random.PRNGKey(0)
    k_x, k_lr, k_c, k_uc, k_s, k_ls, k_w, k_wc = jax.random.split(key, 8)

    B, Cx, H, W = 2, 4, 16, 16          # latent-like input, NCHW
    Clr = 4                             # low-res conditioning channels
    S, D = 8, 32                        # text-embedding seq / hidden
    cond_scale = 3.0

    x = jax.random.normal(k_x, (B, Cx, H, W), jnp.float32)
    low_res = jax.random.normal(k_lr, (B, Clr, H, W), jnp.float32)
    sigma = jax.random.uniform(k_s, (B,), jnp.float32, 0.5, 2.0)
    low_res_sigma = jax.random.uniform(k_ls, (B,), jnp.float32, 0.1, 1.0)
    c = [jax.random.normal(k_c, (B, S, D), jnp.float32)]
    uc = [jax.random.normal(k_uc, (B, S, D), jnp.float32)]

    # Deterministic synthetic inner-model parameters.
    w_param = jax.random.normal(k_w, (Cx + Clr, Cx), jnp.float32) * 0.1
    wc_param = jax.random.normal(k_wc, (D, Cx), jnp.float32) * 0.1
    params = (w_param, wc_param)

    inner = PallasInnerModel(params, compute_dtype=jnp.bfloat16)
    model = CFGUpscaler(inner, uc, cond_scale)

    # Fused CFG path (single Pallas kernel, no batch doubling).
    out = jax.block_until_ready(model(x, sigma, low_res, low_res_sigma, c))
    assert out.shape == (B, Cx, H, W)

    # Pure-JAX f32 reference of the CFG-doubled forward.
    x2 = jnp.concatenate([x] * 2, 0)
    s2_ = jnp.concatenate([sigma] * 2, 0)
    lr2 = jnp.concatenate([low_res] * 2, 0)
    lrs2 = jnp.concatenate([low_res_sigma] * 2, 0)
    c2 = [jnp.concatenate([uc[0], c[0]], 0)]
    y_ref = _inner_model_ref(params, x2, s2_, lr2, lrs2, c2)
    uncond_ref, cond_ref = jnp.split(y_ref, 2, axis=0)
    ref = uncond_ref + (cond_ref - uncond_ref) * cond_scale

    np.testing.assert_allclose(np.asarray(out), np.asarray(ref), rtol=2e-2, atol=2e-2)

    # Also exercise the generic (non-fused) path: doubled Pallas forward + combine kernel.
    y_doubled = inner(x2, s2_, lr2, lrs2, c2)
    out_generic = jax.block_until_ready(cfg_combine_pallas(y_doubled, cond_scale))
    np.testing.assert_allclose(np.asarray(out_generic), np.asarray(ref), rtol=2e-2, atol=2e-2)

    print("KERNEL_OK")
</pallas_src>

<mosaic_0001>
module attributes {stable_mosaic.version = 11 : i64} {
  func.func @_upscaler_kernel(%arg0: i32, %arg1: i32, %arg2: memref<2xf32, #tpu.memory_space<smem>>, %arg3: memref<1x4x1xf32, #tpu.memory_space<vmem>>, %arg4: memref<4x4xbf16, #tpu.memory_space<vmem>>, %arg5: memref<4x4xbf16, #tpu.memory_space<vmem>>, %arg6: memref<1x4x256xf32, #tpu.memory_space<vmem>>, %arg7: memref<1x4x256xf32, #tpu.memory_space<vmem>>, %arg8: memref<1x4x256xf32, #tpu.memory_space<vmem>>) attributes {dimension_semantics = [#tpu.dimension_semantics<parallel>, #tpu.dimension_semantics<parallel>], iteration_bounds = array<i64: 2, 1>, scalar_prefetch = 0 : i64, scratch_operands = 0 : i64, tpu.core_type = #tpu.core_type<tc>, window_params = [{transform_indices = @transform_0, window_bounds = array<i64: 2>}, {transform_indices = @transform_1, window_bounds = array<i64: 1, 4, 1>}, {pipeline_mode = #tpu.pipeline_mode<synchronous>, transform_indices = @transform_2, window_bounds = array<i64: 4, 4>}, {pipeline_mode = #tpu.pipeline_mode<synchronous>, transform_indices = @transform_3, window_bounds = array<i64: 4, 4>}, {transform_indices = @transform_4, window_bounds = array<i64: 1, 4, 256>}, {transform_indices = @transform_5, window_bounds = array<i64: 1, 4, 256>}, {transform_indices = @transform_6, window_bounds = array<i64: 1, 4, 256>}]} {
    %c0 = arith.constant 0 : index
    %c0_0 = arith.constant 0 : index
    %0 = vector.load %arg4[%c0, %c0_0] : memref<4x4xbf16, #tpu.memory_space<vmem>>, vector<4x4xbf16>
    %c0_1 = arith.constant 0 : index
    %c0_2 = arith.constant 0 : index
    %c0_3 = arith.constant 0 : index
    %1 = vector.load %arg6[%c0_1, %c0_2, %c0_3] : memref<1x4x256xf32, #tpu.memory_space<vmem>>, vector<1x4x256xf32>
    %2 = vector.shape_cast %1 : vector<1x4x256xf32> to vector<4x256xf32>
    %3 = arith.truncf %2 : vector<4x256xf32> to vector<4x256xbf16>
    %cst = arith.constant dense<0.000000e+00> : vector<4x256xf32>
    %4 = tpu.matmul %0, %3, %cst {dimension_numbers = #tpu.dot_dimension_numbers<[1], [0], [0], [1], [0, 0, 1, 1], [], []>} : vector<4x4xbf16>, vector<4x256xbf16>, vector<4x256xf32> -> vector<4x256xf32>
    %c0_4 = arith.constant 0 : index
    %c0_5 = arith.constant 0 : index
    %5 = vector.load %arg5[%c0_4, %c0_5] : memref<4x4xbf16, #tpu.memory_space<vmem>>, vector<4x4xbf16>
    %c0_6 = arith.constant 0 : index
    %c0_7 = arith.constant 0 : index
    %c0_8 = arith.constant 0 : index
    %6 = vector.load %arg7[%c0_6, %c0_7, %c0_8] : memref<1x4x256xf32, #tpu.memory_space<vmem>>, vector<1x4x256xf32>
    %7 = vector.shape_cast %6 : vector<1x4x256xf32> to vector<4x256xf32>
    %8 = arith.truncf %7 : vector<4x256xf32> to vector<4x256xbf16>
    %cst_9 = arith.constant dense<0.000000e+00> : vector<4x256xf32>
    %9 = tpu.matmul %5, %8, %cst_9 {dimension_numbers = #tpu.dot_dimension_numbers<[1], [0], [0], [1], [0, 0, 1, 1], [], []>} : vector<4x4xbf16>, vector<4x256xbf16>, vector<4x256xf32> -> vector<4x256xf32>
    %10 = arith.addf %4, %9 : vector<4x256xf32>
    %11 = arith.index_cast %arg0 : i32 to index
    %12 = memref.load %arg2[%11] : memref<2xf32, #tpu.memory_space<smem>>
    %13 = vector.broadcast %12 : f32 to vector<4x256xf32>
    %14 = arith.mulf %10, %13 : vector<4x256xf32>
    %c0_10 = arith.constant 0 : index
    %c0_11 = arith.constant 0 : index
    %c0_12 = arith.constant 0 : index
    %15 = vector.load %arg3[%c0_10, %c0_11, %c0_12] : memref<1x4x1xf32, #tpu.memory_space<vmem>>, vector<1x4x1xf32>
    %16 = vector.shape_cast %15 : vector<1x4x1xf32> to vector<4x1xf32>
    %17 = vector.broadcast %16 : vector<4x1xf32> to vector<4x256xf32>
    %18 = arith.addf %14, %17 : vector<4x256xf32>
    %c0_13 = arith.constant 0 : index
    %c0_14 = arith.constant 0 : index
    %c0_15 = arith.constant 0 : index
    %19 = vector.load %arg8[%c0_13, %c0_14, %c0_15] : memref<1x4x256xf32, #tpu.memory_space<vmem>>, vector<1x4x256xf32>
    %20 = vector.shape_cast %19 : vector<1x4x256xf32> to vector<4x256xf32>
    %21 = vector.shape_cast %18 : vector<4x256xf32> to vector<1x4x256xf32>
    tpu.vector_store %arg8[%c0_13, %c0_14, %c0_15], %21 {strides = array<i32>} : memref<1x4x256xf32, #tpu.memory_space<vmem>>, vector<1x4x256xf32>,
    return
  }
  func.func @transform_0(%arg0: i32, %arg1: i32) -> i32 {
    %c0_i32 = arith.constant 0 : i32
    %c0_i32_0 = arith.constant 0 : i32
    return %c0_i32 : i32
  }
  func.func @transform_1(%arg0: i32, %arg1: i32) -> (i32, i32, i32) {
    %c0_i32 = arith.constant 0 : i32
    %c0_i32_0 = arith.constant 0 : i32
    %c0_i32_1 = arith.constant 0 : i32
    return %arg0, %c0_i32, %c0_i32_0 : i32, i32, i32
  }
  func.func @transform_2(%arg0: i32, %arg1: i32) -> (i32, i32) {
    %c0_i32 = arith.constant 0 : i32
    %c0_i32_0 = arith.constant 0 : i32
    %c0_i32_1 = arith.constant 0 : i32
    return %c0_i32, %c0_i32_0 : i32, i32
  }
  func.func @transform_3(%arg0: i32, %arg1: i32) -> (i32, i32) {
    %c0_i32 = arith.constant 0 : i32
    %c0_i32_0 = arith.constant 0 : i32
    %c0_i32_1 = arith.constant 0 : i32
    return %c0_i32, %c0_i32_0 : i32, i32
  }
  func.func @transform_4(%arg0: i32, %arg1: i32) -> (i32, i32, i32) {
    %c0_i32 = arith.constant 0 : i32
    %c0_i32_0 = arith.constant 0 : i32
    return %arg0, %c0_i32, %arg1 : i32, i32, i32
  }
  func.func @transform_5(%arg0: i32, %arg1: i32) -> (i32, i32, i32) {
    %c0_i32 = arith.constant 0 : i32
    %c0_i32_0 = arith.constant 0 : i32
    return %arg0, %c0_i32, %arg1 : i32, i32, i32
  }
  func.func @transform_6(%arg0: i32, %arg1: i32) -> (i32, i32, i32) {
    %c0_i32 = arith.constant 0 : i32
    %c0_i32_0 = arith.constant 0 : i32
    return %arg0, %c0_i32, %arg1 : i32, i32, i32
  }
}

</mosaic_0001>

<bundles_post_ra>
// kernel: tpu_custom_call.1
= control target key start
LH: loop header
LB: loop body
LE: loop exit
PB: predicated region body
PF: predicated region fallthrough
CT: control target
= control target key end

     0   :  { %s1118_s0 = inlined_call_operand.vmem [shape: f32[2], index: 0, kind: input, shape index: {}]   ;;  %s1119_s1 = inlined_call_operand.vmem [shape: f32[2,4,1], index: 1, kind: input, shape index: {}]   ;;  %s1120_s2 = inlined_call_operand.vmem [shape: bf16[4,4], index: 2, kind: input, shape index: {}]   ;;  %s1121_s3 = inlined_call_operand.vmem [shape: bf16[4,4], index: 3, kind: input, shape index: {}]   ;;  %s1122_s4 = inlined_call_operand.hbm [shape: f32[2,4,256], index: 4, kind: input, shape index: {}]   ;;  %s1123_s5 = inlined_call_operand.hbm [shape: f32[2,4,256], index: 5, kind: input, shape index: {}]   ;;  %s1124_s6 = inlined_call_operand.hbm [shape: f32[2,4,256], index: 6, kind: output, shape index: {}]  }
   0x1   :  { %1128 = sst [smem:[#allocation18_spill]] %s1118_s0 }
   0x2   :  { %11 = vsyncpa [#allocation5], 0 }
   0x3   :  { %12 = vsyncpa [#allocation3], 0 }
   0x4   :  { %14 = vsyncpa [#allocation3 + $0x1], 0 }
   0x5   :  { %15 = vsyncpa [#allocation8], 0 }
   0x6   :  { %17 = vsyncpa [#allocation8 + $0x1], 0 }
   0x7   :  { %18 = vsyncpa [#allocation4], 0 }
   0x8   :  { %20 = vsyncpa [#allocation4 + $0x1], 0  ;;  %s944_s21 = smov 0   ;;  %s946_s22 = smov 0  }
   0x9   :  { %s948_s23 = smov 0   ;;  %s950_s24 = smov 0  }
   0xa   :  { %s952_s25 = smov 0   ;;  %s954_s26 = smov 0  }
   0xb LB: > { %1129 = sst [smem:[#allocation14_spill]] %s901_s25  ;;  %s631_s27 = sadd.s32 4294967295, %s905_s26   ;;  %s905_s26 = sphi %s954_s26, %s26_s26   ;;  %s901_s25 = sphi %s952_s25, %s1144_s25   ;;  %s897_s24 = sphi %s950_s24, %s1143_s24   ;;  %s893_s23 = sphi %s948_s23, %s1147_s23   ;;  %s889_s22 = sphi %s946_s22, %s1146_s22   ;;  %s885_s21 = sphi %s944_s21, %s1145_s21  }
   0xc   : > { %s632_s28 = sadd.s32 4294967294, %s905_s26   ;;  %p149_p0 = scmp.ne.s32.totalorder %s889_s22, %s885_s21 }
   0xd   : > { %p978_p1 = scmp.eq.s32.totalorder %s631_s27, 0  ;;  %p982_p2 = scmp.eq.s32.totalorder %s631_s27, 1 }
   0xe   : > { %p209_p3 = scmp.eq.s32.totalorder %s632_s28, 1  ;;  %p633_p5 = scmp.ge.s32.totalorder %s905_s26, 1 }
   0xf   : > { %p988_p4 = por %p978_p1, %p149_p0  ;;  %p216_p7 = scmp.lt.s32.totalorder %s905_s26, 3 }
  0x10   : > { %p993_p6 = por %p209_p3, %p149_p0  ;;  %s1135_s0 = sld [smem:[#allocation18_spill]] }
  0x11   : > { %p1001_p8 = pnand %p633_p5, %p216_p7  ;;  %s38_s13 = sadd.s32 1, %s901_s25 }
  0x12   : > { %s1133_s8 = scalar_select %p993_p6, 1, 0 }
  0x13   : > { %p670_p10 = pneg %p1001_p8  ;;  %s136_s14 = sadd.s32 1, %s893_s23 }
  0x14   : > { %1134 = sst [smem:[#allocation15_spill]] %s1133_s8  ;;  %p40_p12 = scmp.ge.s32.totalorder %s38_s13, 2 }
  0x15   : > { %p671_p11 = pnand %p670_p10, %p978_p1  ;;  %s907_s15 = smov [#allocation2]  }
  0x16   : > { %s228_s11 = sshll.u32 %s1135_s0, 4  ;;  %s1149_s13 = smov (%p40_p12, %s38_s13), 0  ;;  %s229_s11 = int_to_ptr.vmem [resolvable:$true] %s228_s11 }
  0x17   : > { %673 = dma.vmem_to_smem (!%p671_p11), %s229_s11, 16, %s907_s15, [#allocation5]  }
  0x18   : > { %1137 = sst [smem:[#allocation16_spill]] %s1149_s13  ;;  %p143_p13 = scmp.ne.s32.totalorder %s893_s23, %s889_s22 }
  0x19   : > { %p144_p0 = scmp.eq.s32.totalorder %s905_s26, 0  ;;  %s131_s16 = ssub.s32 %s901_s25, %s1149_s13 }
  0x1a   : > { %p686_p3 = scmp.lt.s32.totalorder %s905_s26, 2  ;;  %p134_p5 = scmp.eq.s32.totalorder %s131_s16, 0 }
  0x1b   : > { %p145_p7 = por %p144_p0, %p143_p13  ;;  %p1022_p9 = por %p982_p2, %p143_p13 }
  0x1c   : > { %s252_s18 = sand.u32 1, %s893_s23   ;;  %s657_s27 = sshll.u32 %s901_s25, 3 }
  0x1d   : > { %s1028_s19 = scalar_select %p134_p5, %s893_s23, %s136_s14  }
  0x1e   : > { %s636_s20 = sshll.u32 %s252_s18, 3  ;;  %s263_s10 = scalar_lea.hbm %s1122_s4, %s657_s27 }
  0x1f   : > { %1139 = sst [smem:[#allocation17_spill]] %s1028_s19  ;;  %s256_s11 = scalar_lea.vmem [#allocation6], %s636_s20 }
  0x20   : > { %s267_s15 = sshll.u32 %s256_s11, 4  ;;  %s265_s0 = sshll.u32 %s263_s10, 4  ;;  %s268_s15 = int_to_ptr.vmem [resolvable:$true] %s267_s15  ;;  %s266_s0 = int_to_ptr.hbm [resolvable:$true] %s265_s0 }
  0x21   : > { %p675_p10 = pnand %p686_p3, %p145_p7  ;;  %s285_s13 = scalar_lea.hbm %s1123_s5, %s657_s27 }
  0x22   : > { %s253_s8 = scalar_lea.sflag [#allocation3], %s252_s18  ;;  %s287_s14 = sshll.u32 %s285_s13, 4  ;;  %s288_s14 = int_to_ptr.hbm [resolvable:$true] %s287_s14 }
  0x23   : > { %677 = dma.hbm_to_vmem [thread:$0]  (!%p675_p10), %s266_s0, 128, %s268_s15, %s253_s8  }
  0x24   : > { %s278_s19 = scalar_lea.vmem [#allocation7], %s636_s20  ;;  %s275_s28 = scalar_lea.sflag [#allocation8], %s252_s18 }
  0x25   : > { %s289_s25 = sshll.u32 %s278_s19, 4  ;;  %298 = sbr.rel (%p1001_p8) target bundleno = 212 (0xd4), region = 44  ;;  %s290_s25 = int_to_ptr.vmem [resolvable:$true] %s289_s25 }
  0x26   : > { %680 = dma.hbm_to_vmem [thread:$0]  (!%p675_p10), %s288_s14, 128, %s290_s25, %s275_s28  }
  0x2a   : > { %868 = dma.done.wait (%p978_p1), [#allocation5], 16  }
  0x2b   : > { %870 = vsyncadd (%p978_p1), [#allocation5], 4294967280  ;;  %s1046_s27 = sand.u32 1, %s889_s22  }
  0x2c   : > { %s1049_s0 = sshll.u32 %s1046_s27, 3  ;;  %s306_s8 = scalar_lea.sflag [#allocation3], %s1046_s27 }
  0x2d   : > { %s309_s25 = scalar_lea.vmem [#allocation6], %s1049_s0 }
  0x2e   : > { %872 = dma.done.wait (%p988_p4), %s306_s8, 128  }
  0x2f   : > { %874 = vsyncadd (%p988_p4), %s306_s8, 4294967168  ;;  %s316_s29 = scalar_lea.sflag [#allocation8], %s1046_s27  ;;  %s319_s12 = scalar_lea.vmem [#allocation7], %s1049_s0 }
  0x30   : > { %876 = dma.done.wait (%p988_p4), %s316_s29, 128  }
  0x31   : > { %878 = vsyncadd (%p988_p4), %s316_s29, 4294967168 }
  0x32   : > { %325 = sfence }
  0x33   : > { %v368_v0 = vld [vmem:[%s309_s25] sm:$0xff]  ;;  %p359_p1 = scmp.lt.s32.totalorder %s897_s24, 1  ;;  %v908_v1 = vmov 0   ;;  %v378_v2 = vld [vmem:[%s319_s12] sm:$0xff]  ;;  %vm391_vm0 = vcmask 1041408   ;;  %vm387_vm1 = vcmask 31744  }
  0x34   : > { %370 = vst [vmem:[#allocation1] ss:$2 sm:$0xff] %v368_v0  ;;  %739 = vset.pattern.permute.xlu0 %v908_v1  ;;  %v367_v10 = vld [vmem:[%s1120_s2] sm:$0x3]  ;;  %s459_s30 = sld [smem:[#allocation2 + %s897_s24]]  ;;  %s659_s16 = sshll.u32 %s897_s24, 3 }
  0x35   : > { %s360_s13 = scalar_select %p359_p1, %s897_s24, 1  ;;  %v377_v17 = vld [vmem:[%s1121_s3] sm:$0x3]  ;;  %vm474_vm2 = vcmask 1043456  }
  0x36   : > { %s492_s8 = scalar_lea.hbm %s1124_s6, %s659_s16  ;;  %s358_s25 = scalar_lea.vmem [#allocation9], %s1049_s0 }
  0x37   : > { %s647_s18 = sshll.u32 %s360_s13, 2  ;;  %s494_s29 = sshll.u32 %s358_s25, 4  ;;  %s495_s29 = int_to_ptr.vmem [resolvable:$true] %s494_s29 }
  0x38   : > { %s362_s9 = scalar_lea.vmem %s1119_s1, %s647_s18  ;;  %s496_s12 = sshll.u32 %s492_s8, 4  ;;  %s497_s12 = int_to_ptr.hbm [resolvable:$true] %s496_s12 }
  0x39   : > { %v463_v3 = vld [vmem:[%s362_s9] sm:$0xf]  ;;  %s479_s24 = scalar_lea.sflag [#allocation4], %s1046_s27  ;;  %s829_s13 = sshra.s32 %s497_s12, 4  ;;  %s830_s13 = int_to_ptr.hbm [resolvable:$true] %s829_s13 }
  0x3a   : > { %466 = vperm.xlu0 %739, %v463_v3   ;;  %v460_v22 = vstv %s459_s30  ;;  %s831_s18 = scalar_lea.hbm %s830_s13, 8  ;;  %s835_s20 = scalar_lea.hbm %s1124_s6, 16 }
  0x3b   : > { %v371_v4 = vld.sshfl [vmem:[#allocation1] sm:$0xff pattern:$0x75316420]  ;;  %v372_v5 = vld.sshfl [vmem:[#allocation1 + $0x8] sm:$0xff pattern:$0x75316420]  ;;  %p832_p2 = scmp.ne.s32.totalorder %s830_s13, %s831_s18  ;;  %p836_p11 = scmp.lt.s32.totalorder %s830_s13, %s1124_s6 }
  0x3c   : > { %v375_v6 = vpack.c.bf16 %v371_v4, %v371_v4  ;;  %v376_v7 = vpack.c.bf16 %v372_v5, %v372_v5  ;;  %380 = vst [vmem:[#allocation1] ss:$2 sm:$0xff] %v378_v2  ;;  %p837_p12 = scmp.lt.s32.totalorder %s835_s20, %s831_s18 }
  0x3d   : > { %p833_p4 = pnand %p832_p2, %p1022_p9 }
  0x3e   : > { %v428_v8 = vsel %vm391_vm0, %v375_v6, 0  ;;  %v431_v9 = vsel %vm391_vm0, %v376_v7, 0  ;;  %p838_p13 = por %p837_p12, %p836_p11 }
  0x3f   : > { %440 = vmatpush.bf16.msra.mxu2 %v428_v8  ;;  %453 = vmatpush.bf16.msra.mxu3 %v431_v9  ;;  %p834_p8 = pneg %p833_p4 }
  0x41   : > { %p839_p0 = pnand %p838_p13, %p834_p8 }
  0x42   : > { %650 = vmatmul.msk.bf16.vlgmr.msra.gmra.mxu2 %vm387_vm1, %v367_v10  ;;  %651 = vmatmul.msk.bf16.vlgmr.msra.gmra.mxu3 %vm387_vm1, %v367_v10 }
  0x43   : > { %v381_v11 = vld.sshfl [vmem:[#allocation1] sm:$0xff pattern:$0x75316420]  ;;  %v382_v12 = vld.sshfl [vmem:[#allocation1 + $0x8] sm:$0xff pattern:$0x75316420] }
  0x44   : > { %v385_v13 = vpack.c.bf16 %v381_v11, %v381_v11  ;;  %v386_v14 = vpack.c.bf16 %v382_v12, %v382_v12 }
  0x46   : > { %v393_v15 = vsel %vm391_vm0, %v385_v13, 0  ;;  %v396_v16 = vsel %vm391_vm0, %v386_v14, 0 }
  0x47   : > { %405 = vmatpush.bf16.msra.mxu0 %v393_v15  ;;  %418 = vmatpush.bf16.msra.mxu1 %v396_v16 }
  0x4a   : > { %648 = vmatmul.msk.bf16.vlgmr.msra.gmra.mxu0 %vm387_vm1, %v377_v17  ;;  %649 = vmatmul.msk.bf16.vlgmr.msra.gmra.mxu1 %vm387_vm1, %v377_v17 }
  0xac   : > { %v467_v25 = vpop.permute.xlu0 %466 }
  0xc5   : > { %v442_v18 = vpop.f32.mrf.mxu2  ;;  %v455_v19 = vpop.f32.mrf.mxu3 }
  0xc7   : > { %v407_v20 = vpop.f32.mrf.mxu0  ;;  %v420_v21 = vpop.f32.mrf.mxu1 }
  0xc8   : > { %v443_v23 = vadd.f32 %v442_v18, %v407_v20  ;;  %v456_v24 = vadd.f32 %v455_v19, %v420_v21 }
  0xca   : > { %v461_v26 = vmul.f32 %v460_v22, %v443_v23  ;;  %v462_v27 = vmul.f32 %v460_v22, %v456_v24 }
  0xcc   : > { %v470_v28 = vadd.f32 %v467_v25, %v462_v27  ;;  %v469_v31 = vadd.f32 %v467_v25, %v461_v26 }
  0xcd   : > { %v444_v29 = vpop.f32.mrf.mxu2  ;;  %v457_v30 = vpop.f32.mrf.mxu3 }
  0xce   : > { %v473_v32 = vrot.slane %v470_v28, 4 }
  0xcf   : > { %v409_v33 = vpop.f32.mrf.mxu0  ;;  %v422_v34 = vpop.f32.mrf.mxu1 }
  0xd0   : > { %v475_v35 = vsel %vm474_vm2, %v469_v31, %v473_v32 }
  0xd1   : > { %477 = vst [vmem:[%s358_s25] sm:$0xff] %v475_v35 }
  0xd2   : > { %842 = shalt.err (!%p839_p0)
}
  0xd3   : > { %668 = dma.vmem_to_hbm [thread:$0]  (%p1022_p9), %s495_s29, 128, %s497_s12, %s479_s24  }
  0xd4 PF: > { %s508_s10 = sand.u32 1, %s885_s21   ;;  %p1141_p3 = scmp.ge.s32.totalorder %s905_s26, 2 }
  0xd5   : > { %s509_s11 = scalar_lea.sflag [#allocation4], %s508_s10 }
  0xd6   : > { %p682_p5 = pnand %p1141_p3, %p993_p6 }
  0xd8   : > { %p683_p7 = pneg %p682_p5 }
  0xda   : > { %880 = dma.done.wait (%p683_p7), %s509_s11, 128  }
  0xdb   : > { %882 = vsyncadd (%p683_p7), %s509_s11, 4294967168  ;;  %s26_s26 = sadd.s32 1, %s905_s26   ;;  %s1142_s15 = sld [smem:[#allocation17_spill]] }
  0xdc   : > { %p23_p10 = scmp.ge.s32.totalorder %s26_s26, 4   ;;  %s1143_s24 = sld [smem:[#allocation14_spill]] }
  0xdd   : > { %s1144_s25 = sld [smem:[#allocation16_spill]]  ;;  %s1145_s21 = smov %s889_s22 }
  0xde   : > { %s1146_s22 = smov %s893_s23  ;;  %25 = sbr.rel (!%p23_p10) target bundleno = 11 (0xb), region = 110 }
  0xe1   : > { %s1147_s23 = smov %s1142_s15 }
  0xe3   :  { %515 = vsyncpa [#allocation3], 1 }
  0xe4   :  { %517 = vsyncpa [#allocation3 + $0x1], 1 }
  0xe5   :  { %518 = vsyncpa [#allocation8], 1 }
  0xe6   :  { %520 = vsyncpa [#allocation8 + $0x1], 1 }
  0xe7   :  { %521 = vsyncpa [#allocation4], 1 }
  0xe8   :  { %523 = vsyncpa [#allocation4 + $0x1], 1 }
  0xe9   :  { %524 = vsyncpa [#allocation5], 1 }
  0xea   :  { %526 = vsyncpa [#allocation5 + $0x1], 1 }

</bundles_post_ra>
